<compile_context>
chip_gen: v7x
topology: tpu7x:2x2x1
jax: 0.10.0
libtpu: 0.0.40
codegen_flags: <defaults>
</compile_context>

<pallas_src>
import functools

import jax
import jax.numpy as jnp
from jax import lax
from jax.experimental import pallas as pl
from jax.experimental.pallas import tpu as pltpu


def _round_up(n, m):
    return ((n + m - 1) // m) * m


# ---------------------------------------------------------------------------
# Stage 1: fused input projection, (T*B) folded into the matmul M axis.
# ---------------------------------------------------------------------------
def _proj_kernel(x_ref, wx_ref, b_ref, o_ref):
    # x_ref: (Mt, D)   wx_ref: (D, 3*Hn)   b_ref: (1, 3*Hn)   o_ref: (Mt, 3*Hn)
    o_ref[...] = (
        jnp.dot(x_ref[...], wx_ref[...], preferred_element_type=jnp.float32)
        + b_ref[...]
    )


# ---------------------------------------------------------------------------
# Stage 2: the recurrence, T-chunked grid, H carried in a VMEM scratch.
# ---------------------------------------------------------------------------
def _recurrent_kernel(xproj_ref, whzr_ref, whh_ref, out_ref, hlast_ref, h_scr,
                      *, seq_len, chunk_len, unroll, mask_tail):
    # xproj_ref: (Tt, B, 3*Hn)   whzr_ref: (Hn, 2*Hn)   whh_ref: (Hn, Hn)
    # out_ref:   (Tt, B, Hn)     hlast_ref: (B, Hn)     h_scr: (B, Hn) f32
    Hn = whh_ref.shape[0]
    mm_dtype = whzr_ref.dtype  # matmul operand dtype (f32, or bf16 on v6e/v7x)
    chunk = pl.program_id(0)

    @pl.when(chunk == 0)
    def _():
        h_scr[...] = jnp.zeros_like(h_scr)  # H=None default in the module

    def step(t, H):
        gx = xproj_ref[t]  # (B, 3*Hn); biases already folded in at stage 1
        # Fused update+reset gate matmul: H @ [W_hz | W_hr] -> (B, 2*Hn)
        zr = jnp.dot(H.astype(mm_dtype), whzr_ref[...],
                     preferred_element_type=jnp.float32)
        Z = jax.nn.sigmoid(gx[:, :Hn] + zr[:, :Hn])
        R = jax.nn.sigmoid(gx[:, Hn:2 * Hn] + zr[:, Hn:])
        H_tilde = jnp.tanh(
            gx[:, 2 * Hn:]
            + jnp.dot((R * H).astype(mm_dtype), whh_ref[...],
                      preferred_element_type=jnp.float32))
        # = Z*H + (1-Z)*H_tilde, with one fewer VPU mul.
        H_new = H_tilde + Z * (H - H_tilde)
        if mask_tail:
            # Padded tail timesteps (t_global >= seq_len) must not advance H.
            t_global = chunk * chunk_len + t
            H_new = jnp.where(t_global < seq_len, H_new, H)
        out_ref[t] = H_new.astype(out_ref.dtype)  # lane-dense (B, 128k) store
        return H_new

    H0 = h_scr[...]
    H_last = lax.fori_loop(0, chunk_len, step, H0, unroll=unroll)
    h_scr[...] = H_last
    hlast_ref[...] = H_last.astype(hlast_ref.dtype)


def gru_forward(inputs, W_xz, W_hz, b_z, W_xr, W_hr, b_r, W_xh, W_hh, b_h,
                matmul_dtype=jnp.float32):
    T, B, D = inputs.shape
    Hn = W_xz.shape[1]

    B_pad = _round_up(B, 8)        # fill vreg sublanes
    D_pad = _round_up(D, 128)      # 128-aligned contraction dim
    Hn_pad = _round_up(Hn, 128)    # 128-aligned output / contraction dim

    # ---- stage-2 time-chunk size: bound streamed VMEM (~12 MiB budget) ------
    weights_bytes = 4 * 2 * (Hn_pad * 2 * Hn_pad + Hn_pad * Hn_pad)
    per_t_bytes = 4 * 2 * (B_pad * 3 * Hn_pad + B_pad * Hn_pad)
    Tt = int(max(1, min(T, 256, ((12 << 20) - weights_bytes) // per_t_bytes)))
    T_pad = _round_up(T, Tt)

    # ---- pad & pack parameters (zero padding is exact, see header comment) --
    x_p = jnp.pad(inputs, ((0, T_pad - T), (0, B_pad - B), (0, D_pad - D))
                  ).astype(matmul_dtype)

    def pad_w(w, rows, cols):
        return jnp.pad(w, ((0, rows - w.shape[0]), (0, cols - w.shape[1])))

    def pad_b(b):
        return jnp.pad(b, (0, Hn_pad - Hn))

    # Packed input-projection weights, gate order [z | r | h]: (D_pad, 3*Hn_pad)
    Wx = jnp.concatenate([pad_w(W_xz, D_pad, Hn_pad),
                          pad_w(W_xr, D_pad, Hn_pad),
                          pad_w(W_xh, D_pad, Hn_pad)], axis=1).astype(matmul_dtype)
    b_all = jnp.concatenate([pad_b(b_z), pad_b(b_r), pad_b(b_h)]
                            ).reshape(1, 3 * Hn_pad).astype(jnp.float32)
    # Packed recurrent weights: [W_hz | W_hr] -> (Hn_pad, 2*Hn_pad), and W_hh.
    Whzr = jnp.concatenate([pad_w(W_hz, Hn_pad, Hn_pad),
                            pad_w(W_hr, Hn_pad, Hn_pad)], axis=1).astype(matmul_dtype)
    Whh = pad_w(W_hh, Hn_pad, Hn_pad).astype(matmul_dtype)

    # ---- Stage 1: (T*B) folded into M, tiled matmul against resident Wx -----
    M = T_pad * B_pad
    M_tile = 256 if M >= 256 else M          # M is a multiple of 8
    M_pad = _round_up(M, M_tile)
    x_flat = jnp.pad(x_p.reshape(M, D_pad), ((0, M_pad - M), (0, 0)))

    xproj_flat = pl.pallas_call(
        _proj_kernel,
        out_shape=jax.ShapeDtypeStruct((M_pad, 3 * Hn_pad), jnp.float32),
        grid_spec=pltpu.PrefetchScalarGridSpec(
            num_scalar_prefetch=0,
            grid=(M_pad // M_tile,),
            in_specs=[
                pl.BlockSpec((M_tile, D_pad), lambda m: (m, 0)),
                pl.BlockSpec((D_pad, 3 * Hn_pad), lambda m: (0, 0)),   # resident
                pl.BlockSpec((1, 3 * Hn_pad), lambda m: (0, 0)),       # resident
            ],
            out_specs=pl.BlockSpec((M_tile, 3 * Hn_pad), lambda m: (m, 0)),
        ),
        compiler_params=pltpu.CompilerParams(
            dimension_semantics=("parallel",),
            vmem_limit_bytes=32 * 1024 * 1024),
    )(x_flat, Wx, b_all)

    xproj = xproj_flat[:M].reshape(T_pad, B_pad, 3 * Hn_pad)

    # ---- Stage 2: sequential recurrence, T-chunked, H carried in scratch ----
    vregs_per_tensor = max(1, (B_pad * Hn_pad) // 1024)
    unroll = int(max(1, min(Tt, 8, 32 // vregs_per_tensor)))

    kernel = functools.partial(_recurrent_kernel,
                               seq_len=T, chunk_len=Tt, unroll=unroll,
                               mask_tail=(T_pad != T))

    out_p, h_last_p = pl.pallas_call(
        kernel,
        out_shape=(
            jax.ShapeDtypeStruct((T_pad, B_pad, Hn_pad), jnp.float32),
            jax.ShapeDtypeStruct((B_pad, Hn_pad), jnp.float32),
        ),
        grid_spec=pltpu.PrefetchScalarGridSpec(
            num_scalar_prefetch=0,
            grid=(T_pad // Tt,),
            in_specs=[
                pl.BlockSpec((Tt, B_pad, 3 * Hn_pad), lambda i: (i, 0, 0)),
                pl.BlockSpec((Hn_pad, 2 * Hn_pad), lambda i: (0, 0)),  # resident
                pl.BlockSpec((Hn_pad, Hn_pad), lambda i: (0, 0)),      # resident
            ],
            out_specs=[
                pl.BlockSpec((Tt, B_pad, Hn_pad), lambda i: (i, 0, 0)),
                pl.BlockSpec((B_pad, Hn_pad), lambda i: (0, 0)),
            ],
            scratch_shapes=[pltpu.VMEM((B_pad, Hn_pad), jnp.float32)],
        ),
        compiler_params=pltpu.CompilerParams(
            dimension_semantics=("arbitrary",),   # serial recurrence
            vmem_limit_bytes=32 * 1024 * 1024),
    )(xproj, Whzr, Whh)

    # Strip padding.
    outputs = out_p[:T, :B, :Hn]
    h_final = h_last_p[:B, :Hn]
    return outputs, h_final


def gru_reference(inputs, W_xz, W_hz, b_z, W_xr, W_hr, b_r, W_xh, W_hh, b_h):
    """Pure-JAX reference mirroring the PyTorch forward."""
    T, B, D = inputs.shape
    Hn = W_xz.shape[1]
    H = jnp.zeros((B, Hn), jnp.float32)
    outs = []
    for t in range(T):
        X = inputs[t]
        Z = jax.nn.sigmoid(X @ W_xz + H @ W_hz + b_z)
        R = jax.nn.sigmoid(X @ W_xr + H @ W_hr + b_r)
        H_tilde = jnp.tanh(X @ W_xh + (R * H) @ W_hh + b_h)
        H = Z * H + (1.0 - Z) * H_tilde
        outs.append(H)
    return jnp.stack(outs, axis=0), H


if __name__ == "__main__":
    seq_len, batch, num_inputs, num_hiddens = 8, 4, 16, 32
    sigma = 0.01

    key = jax.random.PRNGKey(0)
    k_x, k_xz, k_hz, k_xr, k_hr, k_xh, k_hh = jax.random.split(key, 7)

    inputs = jax.random.normal(k_x, (seq_len, batch, num_inputs), jnp.float32)

    # Parameter init matching the module's shapes:
    # W_x* ~ N(0,1)*sigma (num_inputs, num_hiddens), W_h* ~ N(0,1)*sigma
    # (num_hiddens, num_hiddens), b_* = zeros(num_hiddens).
    W_xz = jax.random.normal(k_xz, (num_inputs, num_hiddens), jnp.float32) * sigma
    W_hz = jax.random.normal(k_hz, (num_hiddens, num_hiddens), jnp.float32) * sigma
    b_z = jnp.zeros((num_hiddens,), jnp.float32)
    W_xr = jax.random.normal(k_xr, (num_inputs, num_hiddens), jnp.float32) * sigma
    W_hr = jax.random.normal(k_hr, (num_hiddens, num_hiddens), jnp.float32) * sigma
    b_r = jnp.zeros((num_hiddens,), jnp.float32)
    W_xh = jax.random.normal(k_xh, (num_inputs, num_hiddens), jnp.float32) * sigma
    W_hh = jax.random.normal(k_hh, (num_hiddens, num_hiddens), jnp.float32) * sigma
    b_h = jnp.zeros((num_hiddens,), jnp.float32)

    outputs, h_final = gru_forward(inputs, W_xz, W_hz, b_z,
                                   W_xr, W_hr, b_r,
                                   W_xh, W_hh, b_h)
    jax.block_until_ready((outputs, h_final))

    # Correctness check against pure-JAX reference (f32 matmul path).
    ref_out, ref_h = gru_reference(inputs, W_xz, W_hz, b_z,
                                   W_xr, W_hr, b_r,
                                   W_xh, W_hh, b_h)
    assert jnp.allclose(outputs, ref_out, atol=1e-5, rtol=1e-5)
    assert jnp.allclose(h_final, ref_h, atol=1e-5, rtol=1e-5)

    print("KERNEL_OK")
</pallas_src>

<mosaic_0001>
module attributes {stable_mosaic.version = 11 : i64} {
  func.func @_proj_kernel(%arg0: i32, %arg1: memref<64x128xf32, #tpu.memory_space<vmem>>, %arg2: memref<128x384xf32, #tpu.memory_space<vmem>>, %arg3: memref<1x384xf32, #tpu.memory_space<vmem>>, %arg4: memref<64x384xf32, #tpu.memory_space<vmem>>) attributes {dimension_semantics = [#tpu.dimension_semantics<parallel>], iteration_bounds = array<i64: 1>, scalar_prefetch = 0 : i64, scratch_operands = 0 : i64, tpu.core_type = #tpu.core_type<tc>, window_params = [{transform_indices = @transform_0, window_bounds = array<i64: 64, 128>}, {pipeline_mode = #tpu.pipeline_mode<synchronous>, transform_indices = @transform_1, window_bounds = array<i64: 128, 384>}, {pipeline_mode = #tpu.pipeline_mode<synchronous>, transform_indices = @transform_2, window_bounds = array<i64: 1, 384>}, {transform_indices = @transform_3, window_bounds = array<i64: 64, 384>}]} {
    %c0 = arith.constant 0 : index
    %c0_0 = arith.constant 0 : index
    %0 = vector.load %arg1[%c0, %c0_0] : memref<64x128xf32, #tpu.memory_space<vmem>>, vector<64x128xf32>
    %c0_1 = arith.constant 0 : index
    %c0_2 = arith.constant 0 : index
    %1 = vector.load %arg2[%c0_1, %c0_2] : memref<128x384xf32, #tpu.memory_space<vmem>>, vector<128x384xf32>
    %cst = arith.constant dense<0.000000e+00> : vector<64x384xf32>
    %2 = tpu.matmul %0, %1, %cst {dimension_numbers = #tpu.dot_dimension_numbers<[1], [0], [0], [1], [0, 0, 1, 1], [], []>} : vector<64x128xf32>, vector<128x384xf32>, vector<64x384xf32> -> vector<64x384xf32>
    %c0_3 = arith.constant 0 : index
    %c0_4 = arith.constant 0 : index
    %3 = vector.load %arg3[%c0_3, %c0_4] : memref<1x384xf32, #tpu.memory_space<vmem>>, vector<1x384xf32>
    %4 = vector.broadcast %3 : vector<1x384xf32> to vector<64x384xf32>
    %5 = arith.addf %2, %4 : vector<64x384xf32>
    %c0_5 = arith.constant 0 : index
    %c0_6 = arith.constant 0 : index
    %6 = vector.load %arg4[%c0_5, %c0_6] : memref<64x384xf32, #tpu.memory_space<vmem>>, vector<64x384xf32>
    tpu.vector_store %arg4[%c0_5, %c0_6], %5 {strides = array<i32>} : memref<64x384xf32, #tpu.memory_space<vmem>>, vector<64x384xf32>,
    return
  }
  func.func @transform_0(%arg0: i32) -> (i32, i32) {
    %c0_i32 = arith.constant 0 : i32
    %c0_i32_0 = arith.constant 0 : i32
    return %arg0, %c0_i32 : i32, i32
  }
  func.func @transform_1(%arg0: i32) -> (i32, i32) {
    %c0_i32 = arith.constant 0 : i32
    %c0_i32_0 = arith.constant 0 : i32
    %c0_i32_1 = arith.constant 0 : i32
    return %c0_i32, %c0_i32_0 : i32, i32
  }
  func.func @transform_2(%arg0: i32) -> (i32, i32) {
    %c0_i32 = arith.constant 0 : i32
    %c0_i32_0 = arith.constant 0 : i32
    %c0_i32_1 = arith.constant 0 : i32
    return %c0_i32, %c0_i32_0 : i32, i32
  }
  func.func @transform_3(%arg0: i32) -> (i32, i32) {
    %c0_i32 = arith.constant 0 : i32
    %c0_i32_0 = arith.constant 0 : i32
    return %arg0, %c0_i32 : i32, i32
  }
}

</mosaic_0001>

<bundles_post_ra>
// kernel: tpu_custom_call.1
= control target key start
LH: loop header
LB: loop body
LE: loop exit
PB: predicated region body
PF: predicated region fallthrough
CT: control target
= control target key end

     0   :  { %8 = vsyncpa [#allocation3], 0  ;;  %s689_s0 = inlined_call_operand.hbm [shape: f32[64,128], index: 0, kind: input, shape index: {}]   ;;  %s690_s1 = inlined_call_operand.hbm [shape: f32[128,384], index: 1, kind: input, shape index: {}]   ;;  %s691_s2 = inlined_call_operand.vmem [shape: f32[1,384], index: 2, kind: input, shape index: {}]   ;;  %s692_s3 = inlined_call_operand.hbm [shape: f32[64,384], index: 3, kind: output, shape index: {}]  }
   0x1   :  { %9 = vsyncpa [#allocation6], 0 }
   0x2   :  { %10 = vsyncpa [#allocation4], 0  ;;  %s588_s12 = smov [#allocation2]   ;;  %s516_s16 = scalar_lea.hbm %s689_s0, 1024 }
   0x3   :  { %s16_s13 = sshll.u32 %s588_s12, 4  ;;  %p517_p0 = scmp.ne.s32.totalorder %s689_s0, %s516_s16  ;;  %s17_s13 = int_to_ptr.vmem [resolvable:$true] %s16_s13 }
   0x4   :  { %p520_p1 = scmp.lt.u32.totalorder %s516_s16, %s689_s0 }
   0x6   :  { %p522_p2 = pnand %p520_p1, %p517_p0 }
   0x8   :  { %525 = shalt.err (!%p522_p2)
}
   0x9   :  { %s526_s21 = scalar_lea.vmem %s17_s13, 1024  ;;  %p531_p4 = scmp.lt.s32.totalorder %s17_s13, %s17_s13 }
   0xa   :  { %p527_p3 = scmp.ne.s32.totalorder %s17_s13, %s526_s21  ;;  %p532_p5 = scmp.lt.s32.totalorder %s526_s21, %s526_s21 }
   0xc   :  { %p533_p6 = por %p532_p5, %p531_p4 }
   0xe   :  { %p534_p7 = pnand %p533_p6, %p527_p3 }
  0x10   :  { %537 = shalt.err (!%p534_p7)
}
  0x11   :  { %s589_s22 = smov 128   ;;  %s590_s23 = smov 8  }
  0x12   :  { %22 = dma.hbm_to_vmem [thread:$0]  %s689_s0, 1024, %s17_s13, [#allocation3], %s589_s22, %s589_s22, %s590_s23  }
  0x13   :  { %s591_s26 = smov [#allocation5]   ;;  %s538_s30 = scalar_lea.hbm %s690_s1, 6144 }
  0x14   :  { %s28_s27 = sshll.u32 %s591_s26, 4  ;;  %p539_p8 = scmp.ne.s32.totalorder %s690_s1, %s538_s30  ;;  %s29_s27 = int_to_ptr.vmem [resolvable:$true] %s28_s27 }
  0x15   :  { %p542_p9 = scmp.lt.u32.totalorder %s538_s30, %s690_s1 }
  0x17   :  { %p544_p10 = pnand %p542_p9, %p539_p8 }
  0x19   :  { %547 = shalt.err (!%p544_p10)
}
  0x1a   :  { %s548_s8 = scalar_lea.vmem %s29_s27, 6144  ;;  %p553_p12 = scmp.lt.s32.totalorder %s29_s27, %s29_s27 }
  0x1b   :  { %p549_p11 = scmp.ne.s32.totalorder %s29_s27, %s548_s8  ;;  %p554_p13 = scmp.lt.s32.totalorder %s548_s8, %s548_s8 }
  0x1d   :  { %p555_p0 = por %p554_p13, %p553_p12 }
  0x1f   :  { %p556_p1 = pnand %p555_p0, %p549_p11 }
  0x21   :  { %559 = shalt.err (!%p556_p1)
}
  0x22   :  { %s592_s0 = smov 384   ;;  %s593_s9 = smov 24  }
  0x23   :  { %34 = dma.hbm_to_vmem [thread:$0]  %s690_s1, 6144, %s29_s27, [#allocation6], %s592_s0, %s592_s0, %s593_s9  }
  0x24   :  { %582 = dma.done.wait [#allocation3], 1024  }
  0x25   :  { %583 = vsyncadd [#allocation3], 4294966272 }
  0x26   :  { %584 = dma.done.wait [#allocation6], 6144  }
  0x27   :  { %585 = vsyncadd [#allocation6], 4294961152  ;;  %v594_v0 = vmov 0.0   ;;  %v52_v1 = vld [vmem:[#allocation5 + $0x8] sm:$0xff]  ;;  %v55_v2 = vld [vmem:[#allocation5 + $0x20] sm:$0xff] }
  0x28   :  { %180 = vmatprep.mubr.f32.mxu0 %v594_v0  ;;  %v51_v3 = vld [vmem:[#allocation5] sm:$0xff]  ;;  %v444_v4 = vpack.c.bf16 %v55_v2, %v52_v1  ;;  %v54_v5 = vld [vmem:[#allocation5 + $0x18] sm:$0xff]  ;;  %v61_v7 = vld [vmem:[#allocation5 + $0x50] sm:$0xff] }
  0x29   :  { %v58_v6 = vld [vmem:[#allocation5 + $0x38] sm:$0xff]  ;;  %v446_v8 = vpack.c.bf16 %v54_v5, %v51_v3  ;;  %v57_v10 = vld [vmem:[#allocation5 + $0x30] sm:$0xff]  ;;  %v60_v11 = vld [vmem:[#allocation5 + $0x48] sm:$0xff] }
  0x2a   :  { %v448_v9 = vpack.c.bf16 %v61_v7, %v58_v6  ;;  %v64_v12 = vld [vmem:[#allocation5 + $0x68] sm:$0xff]  ;;  %445 = vmatprep.subr.bf16.mxu0 %v444_v4  ;;  %v67_v13 = vld [vmem:[#allocation5 + $0x80] sm:$0xff]  ;;  %v450_v14 = vpack.c.bf16 %v60_v11, %v57_v10  ;;  %v66_v17 = vld [vmem:[#allocation5 + $0x78] sm:$0xff] }
  0x2b   :  { %447 = vmatpush1.bf16.msra.mxu0 %v446_v8  ;;  %v63_v15 = vld [vmem:[#allocation5 + $0x60] sm:$0xff]  ;;  %v452_v16 = vpack.c.bf16 %v67_v13, %v64_v12  ;;  %v53_v18 = vld [vmem:[#allocation5 + $0x10] sm:$0xff]  ;;  %v56_v19 = vld [vmem:[#allocation5 + $0x28] sm:$0xff] }
  0x2c   :  { %449 = vmatprep.subr.bf16.mxu0 %v448_v9  ;;  %v70_v20 = vld [vmem:[#allocation5 + $0x98] sm:$0xff]  ;;  %v73_v21 = vld [vmem:[#allocation5 + $0xb0] sm:$0xff]  ;;  %v476_v22 = vpack.c.bf16 %v56_v19, %v53_v18  ;;  %v59_v23 = vld [vmem:[#allocation5 + $0x40] sm:$0xff]  ;;  %v454_v25 = vpack.c.bf16 %v66_v17, %v63_v15  ;;  %v101_v18 = vlaneseq }
  0x2d   :  { %v62_v24 = vld [vmem:[#allocation5 + $0x58] sm:$0xff]  ;;  %v69_v26 = vld [vmem:[#allocation5 + $0x90] sm:$0xff]  ;;  %v456_v28 = vpack.c.bf16 %v73_v21, %v70_v20  ;;  %v72_v29 = vld [vmem:[#allocation5 + $0xa8] sm:$0xff] }
  0x2e   :  { %477 = vmatprep.subr.bf16.mxu1 %v476_v22  ;;  %v480_v27 = vpack.c.bf16 %v62_v24, %v59_v23  ;;  %v65_v30 = vld [vmem:[#allocation5 + $0x70] sm:$0xff]  ;;  %v68_v31 = vld [vmem:[#allocation5 + $0x88] sm:$0xff]  ;;  %v79_v33 = vld [vmem:[#allocation5 + $0xe0] sm:$0xff]  ;;  %v458_v37 = vpack.c.bf16 %v72_v29, %v69_v26  ;;  %v102_v19 = vshrl.u32 %v101_v18, 7 }
  0x2f   :  { %451 = vmatpush1.bf16.msra.mxu0 %v450_v14  ;;  %479 = vmatpush3.bf16.msra.mxu1 %v476_v22  ;;  %v76_v32 = vld [vmem:[#allocation5 + $0xc8] sm:$0xff]  ;;  %v484_v34 = vpack.c.bf16 %v68_v31, %v65_v30  ;;  %v71_v35 = vld [vmem:[#allocation5 + $0xa0] sm:$0xff]  ;;  %v74_v36 = vld [vmem:[#allocation5 + $0xb8] sm:$0xff] }
  0x30   :  { %453 = vmatprep.subr.bf16.mxu0 %v452_v16  ;;  %481 = vmatprep.subr.bf16.mxu1 %v480_v27  ;;  %v460_v38 = vpack.c.bf16 %v79_v33, %v76_v32  ;;  %v75_v39 = vld [vmem:[#allocation5 + $0xc0] sm:$0xff]  ;;  %v78_v40 = vld [vmem:[#allocation5 + $0xd8] sm:$0xff]  ;;  %v85_v42 = vld [vmem:[#allocation5 + $0x110] sm:$0xff]  ;;  %v488_v43 = vpack.c.bf16 %v74_v36, %v71_v35  ;;  %v103_v20 = vsub.s32 0, %v102_v19  ;;  %v107_v22 = vsub.s32 1, %v102_v19 }
  0x31   :  { %v82_v41 = vld [vmem:[#allocation5 + $0xf8] sm:$0xff]  ;;  %v43_v44 = vld [vmem:[#allocation2] sm:$0xff]  ;;  %v77_v45 = vld [vmem:[#allocation5 + $0xd0] sm:$0xff]  ;;  %v462_v47 = vpack.c.bf16 %v78_v40, %v75_v39 }
  0x32   :  { %v80_v46 = vld [vmem:[#allocation5 + $0xe8] sm:$0xff]  ;;  %432 = vmatprep.mubr.f32.mxu1 %v43_v44  ;;  %v464_v48 = vpack.c.bf16 %v85_v42, %v82_v41  ;;  %v81_v49 = vld [vmem:[#allocation5 + $0xf0] sm:$0xff]  ;;  %v91_v52 = vld [vmem:[#allocation5 + $0x140] sm:$0xff] }
  0x33   :  { %455 = vmatpush1.bf16.msra.mxu0 %v454_v25  ;;  %483 = vmatpush3.bf16.msra.mxu1 %v480_v27  ;;  %v84_v50 = vld [vmem:[#allocation5 + $0x108] sm:$0xff]  ;;  %v492_v53 = vpack.c.bf16 %v80_v46, %v77_v45  ;;  %v83_v54 = vld [vmem:[#allocation5 + $0x100] sm:$0xff]  ;;  %v86_v55 = vld [vmem:[#allocation5 + $0x118] sm:$0xff]  ;;  %v111_v25 = vsub.s32 2, %v102_v19 }
  0x34   :  { %457 = vmatprep.subr.bf16.mxu0 %v456_v28  ;;  %485 = vmatprep.subr.bf16.mxu1 %v484_v34  ;;  %v88_v51 = vld [vmem:[#allocation5 + $0x128] sm:$0xff]  ;;  %v466_v56 = vpack.c.bf16 %v84_v50, %v81_v49  ;;  %v87_v58 = vld [vmem:[#allocation5 + $0x120] sm:$0xff]  ;;  %v90_v59 = vld [vmem:[#allocation5 + $0x138] sm:$0xff]  ;;  %v496_v62 = vpack.c.bf16 %v86_v55, %v83_v54 }
  0x35   :  { %v468_v57 = vpack.c.bf16 %v91_v52, %v88_v51  ;;  %v94_v60 = vld [vmem:[#allocation5 + $0x158] sm:$0xff]  ;;  %v97_v61 = vld [vmem:[#allocation5 + $0x170] sm:$0xff]  ;;  %v92_v1 = vld [vmem:[#allocation5 + $0x148] sm:$0xff]  ;;  %v470_v2 = vpack.c.bf16 %v90_v59, %v87_v58 }
  0x36   :  { %v89_v63 = vld [vmem:[#allocation5 + $0x130] sm:$0xff]  ;;  %v472_v3 = vpack.c.bf16 %v97_v61, %v94_v60  ;;  %v96_v5 = vld [vmem:[#allocation5 + $0x168] sm:$0xff]  ;;  %v95_v7 = vld [vmem:[#allocation5 + $0x160] sm:$0xff] }
  0x37   :  { %459 = vmatpush1.bf16.msra.mxu0 %v458_v37  ;;  %487 = vmatpush3.bf16.msra.mxu1 %v484_v34  ;;  %v93_v4 = vld [vmem:[#allocation5 + $0x150] sm:$0xff]  ;;  %v500_v6 = vpack.c.bf16 %v92_v1, %v89_v63  ;;  %v98_v8 = vld [vmem:[#allocation5 + $0x178] sm:$0xff]  ;;  %v44_v11 = vld [vmem:[#allocation2 + $0x8] sm:$0xff] }
  0x38   :  { %461 = vmatprep.subr.bf16.mxu0 %v460_v38  ;;  %489 = vmatprep.subr.bf16.mxu1 %v488_v43  ;;  %v474_v9 = vpack.c.bf16 %v96_v5, %v93_v4  ;;  %v504_v10 = vpack.c.bf16 %v98_v8, %v95_v7  ;;  %v45_v12 = vld [vmem:[#allocation2 + $0x10] sm:$0xff]  ;;  %v46_v13 = vld [vmem:[#allocation2 + $0x18] sm:$0xff]  ;;  %v47_v14 = vld [vmem:[#allocation2 + $0x20] sm:$0xff] }
  0x39   :  { %v48_v15 = vld [vmem:[#allocation2 + $0x28] sm:$0xff]  ;;  %v49_v16 = vld [vmem:[#allocation2 + $0x30] sm:$0xff]  ;;  %v50_v17 = vld [vmem:[#allocation2 + $0x38] sm:$0xff] }
  0x3a   :  { %v99_v21 = vld [vmem:[%s691_s2] sm:$0x7]  ;;  %s595_s2 = smov [#allocation7]  }
  0x3b   :  { %463 = vmatpush1.bf16.msra.mxu0 %v462_v47  ;;  %491 = vmatpush3.bf16.msra.mxu1 %v488_v43  ;;  %v654_v23 = vrot.slane %v99_v21, %v103_v20  ;;  %v656_v24 = vrot.slane %v99_v21, %v107_v22  ;;  %v112_v29 = vrot.slane %v99_v21, %v111_v25  ;;  %s363_s13 = sshll.u32 %s595_s2, 4  ;;  %s364_s13 = int_to_ptr.vmem [resolvable:$true] %s363_s13 }
  0x3c   :  { %465 = vmatprep.subr.bf16.mxu0 %v464_v48  ;;  %493 = vmatprep.subr.bf16.mxu1 %v492_v53  ;;  %s560_s14 = scalar_lea.vmem %s364_s13, 3072  ;;  %p565_p3 = scmp.lt.s32.totalorder %s364_s13, %s364_s13 }
  0x3d   :  { %p561_p2 = scmp.ne.s32.totalorder %s364_s13, %s560_s14  ;;  %p566_p4 = scmp.lt.s32.totalorder %s560_s14, %s560_s14 }
  0x3f   :  { %467 = vmatpush1.bf16.msra.mxu0 %v466_v56  ;;  %495 = vmatpush3.bf16.msra.mxu1 %v492_v53  ;;  %p567_p5 = por %p566_p4, %p565_p3 }
  0x40   :  { %469 = vmatprep.subr.bf16.mxu0 %v468_v57  ;;  %497 = vmatprep.subr.bf16.mxu1 %v496_v62 }
  0x41   :  { %p568_p6 = pnand %p567_p5, %p561_p2 }
  0x43   :  { %471 = vmatpush1.bf16.msra.mxu0 %v470_v2  ;;  %499 = vmatpush3.bf16.msra.mxu1 %v496_v62 }
  0x44   :  { %473 = vmatprep.subr.bf16.mxu0 %v472_v3  ;;  %501 = vmatprep.subr.bf16.mxu1 %v500_v6 }
  0x47   :  { %475 = vmatpush1.bf16.msra.mxu0 %v474_v9  ;;  %503 = vmatpush3.bf16.msra.mxu1 %v500_v6 }
  0x48   :  { %505 = vmatprep.subr.bf16.mxu1 %v504_v10 }
  0x4a   :  { %181 = vmatmul.mubr.f32.vlgmr.msra.gmra.mrb[0].mxu0 %v43_v44 }
  0x4b   :  { %186 = vmatprep.mubr.f32.mxu0 %v594_v0  ;;  %507 = vmatpush3.bf16.msra.mxu1 %v504_v10 }
  0x4e   :  { %187 = vmatmul.mubr.f32.gmra.mrb[2].mxu0 %v44_v11  ;;  %433 = vmatmul.mubr.f32.vlgmr.msra.gmra.mrb[0].mxu1 %v44_v11 }
  0x4f   :  { %192 = vmatprep.mubr.f32.mxu0 %v594_v0  ;;  %435 = vmatprep.mubr.f32.mxu1 %v45_v12 }
  0x52   :  { %193 = vmatmul.mubr.f32.gmra.mrb[4].mxu0 %v45_v12  ;;  %436 = vmatmul.mubr.f32.gmra.mrb[2].mxu1 %v46_v13 }
  0x53   :  { %198 = vmatprep.mubr.f32.mxu0 %v594_v0  ;;  %438 = vmatprep.mubr.f32.mxu1 %v47_v14 }
  0x56   :  { %199 = vmatmul.mubr.f32.gmra.mrb[6].mxu0 %v46_v13  ;;  %439 = vmatmul.mubr.f32.gmra.mrb[4].mxu1 %v48_v15 }
  0x57   :  { %204 = vmatprep.mubr.f32.mxu0 %v594_v0  ;;  %441 = vmatprep.mubr.f32.mxu1 %v49_v16 }
  0x5a   :  { %205 = vmatmul.mubr.f32.gmra.mrb[8].mxu0 %v47_v14  ;;  %442 = vmatmul.mubr.f32.gmra.mrb[6].mxu1 %v50_v17 }
  0x5b   :  { %210 = vmatprep.mubr.f32.mxu0 %v594_v0 }
  0x5e   :  { %211 = vmatmul.mubr.f32.gmra.mrb[10].mxu0 %v48_v15 }
  0x5f   :  { %216 = vmatprep.mubr.f32.mxu0 %v594_v0 }
  0x62   :  { %217 = vmatmul.mubr.f32.gmra.mrb[12].mxu0 %v49_v16 }
  0x63   :  { %222 = vmatprep.mubr.f32.mxu0 %v594_v0 }
  0x66   :  { %223 = vmatmul.mubr.f32.gmra.mrb[14].mxu0 %v50_v17 }
 0x11d   :  { %v182_v26 = vpop.f32.mrb[0].mxu0 }
 0x11e   :  { %v183_v27 = vadd.f32 %v182_v26, %v654_v23  ;;  %v184_v28 = vpop.f32.mrb[1].mxu0 }
 0x11f   :  { %v185_v0 = vadd.f32 %v184_v28, %v656_v24 }
 0x120   :  { %334 = vst [vmem:[#allocation7] sm:$0xff] %v183_v27 }
 0x121   :  { %335 = vst [vmem:[#allocation7 + $0x8] sm:$0xff] %v185_v0  ;;  %v188_v30 = vpop.f32.mrb[2].mxu0  ;;  %v434_v33 = vpop.f32.mrb[0].mxu1 }
 0x122   :  { %v189_v31 = vadd.f32 %v188_v30, %v654_v23  ;;  %v190_v32 = vpop.f32.mrb[3].mxu0  ;;  %v301_v35 = vadd.f32 %v434_v33, %v112_v29  ;;  %v295_v36 = vpop.f32.mrb[1].mxu1 }
 0x123   :  { %v191_v34 = vadd.f32 %v190_v32, %v656_v24  ;;  %v296_v37 = vadd.f32 %v295_v36, %v112_v29 }
 0x124   :  { %337 = vst [vmem:[#allocation7 + $0x18] sm:$0xff] %v189_v31  ;;  %339 = vst [vmem:[#allocation7 + $0x28] sm:$0xff] %v301_v35 }
 0x125   :  { %338 = vst [vmem:[#allocation7 + $0x20] sm:$0xff] %v191_v34  ;;  %v194_v38 = vpop.f32.mrb[4].mxu0  ;;  %336 = vst [vmem:[#allocation7 + $0x10] sm:$0xff] %v296_v37  ;;  %v437_v41 = vpop.f32.mrb[2].mxu1 }
 0x126   :  { %v195_v39 = vadd.f32 %v194_v38, %v654_v23  ;;  %v196_v40 = vpop.f32.mrb[5].mxu0  ;;  %v311_v43 = vadd.f32 %v437_v41, %v112_v29  ;;  %v305_v44 = vpop.f32.mrb[3].mxu1 }
 0x127   :  { %v197_v42 = vadd.f32 %v196_v40, %v656_v24  ;;  %v306_v45 = vadd.f32 %v305_v44, %v112_v29 }
 0x128   :  { %340 = vst [vmem:[#allocation7 + $0x30] sm:$0xff] %v195_v39  ;;  %345 = vst [vmem:[#allocation7 + $0x58] sm:$0xff] %v311_v43 }
 0x129   :  { %341 = vst [vmem:[#allocation7 + $0x38] sm:$0xff] %v197_v42  ;;  %v200_v46 = vpop.f32.mrb[6].mxu0  ;;  %342 = vst [vmem:[#allocation7 + $0x40] sm:$0xff] %v306_v45  ;;  %v440_v49 = vpop.f32.mrb[4].mxu1 }
 0x12a   :  { %v201_v47 = vadd.f32 %v200_v46, %v654_v23  ;;  %v202_v48 = vpop.f32.mrb[7].mxu0  ;;  %v321_v51 = vadd.f32 %v440_v49, %v112_v29  ;;  %v315_v52 = vpop.f32.mrb[5].mxu1 }
 0x12b   :  { %v203_v50 = vadd.f32 %v202_v48, %v656_v24  ;;  %v316_v53 = vadd.f32 %v315_v52, %v112_v29 }
 0x12c   :  { %343 = vst [vmem:[#allocation7 + $0x48] sm:$0xff] %v201_v47  ;;  %351 = vst [vmem:[#allocation7 + $0x88] sm:$0xff] %v321_v51 }
 0x12d   :  { %344 = vst [vmem:[#allocation7 + $0x50] sm:$0xff] %v203_v50  ;;  %v206_v54 = vpop.f32.mrb[8].mxu0  ;;  %348 = vst [vmem:[#allocation7 + $0x70] sm:$0xff] %v316_v53  ;;  %v443_v57 = vpop.f32.mrb[6].mxu1 }
 0x12e   :  { %v207_v55 = vadd.f32 %v206_v54, %v654_v23  ;;  %v208_v56 = vpop.f32.mrb[9].mxu0  ;;  %v331_v59 = vadd.f32 %v443_v57, %v112_v29  ;;  %v325_v60 = vpop.f32.mrb[7].mxu1 }
 0x12f   :  { %v209_v58 = vadd.f32 %v208_v56, %v656_v24  ;;  %v326_v61 = vadd.f32 %v325_v60, %v112_v29 }
 0x130   :  { %346 = vst [vmem:[#allocation7 + $0x60] sm:$0xff] %v207_v55  ;;  %357 = vst [vmem:[#allocation7 + $0xb8] sm:$0xff] %v331_v59 }
 0x131   :  { %347 = vst [vmem:[#allocation7 + $0x68] sm:$0xff] %v209_v58  ;;  %v212_v62 = vpop.f32.mrb[10].mxu0  ;;  %354 = vst [vmem:[#allocation7 + $0xa0] sm:$0xff] %v326_v61 }
 0x132   :  { %v213_v63 = vadd.f32 %v212_v62, %v654_v23  ;;  %v214_v1 = vpop.f32.mrb[11].mxu0 }
 0x133   :  { %v215_v2 = vadd.f32 %v214_v1, %v656_v24 }
 0x134   :  { %349 = vst [vmem:[#allocation7 + $0x78] sm:$0xff] %v213_v63 }
 0x135   :  { %350 = vst [vmem:[#allocation7 + $0x80] sm:$0xff] %v215_v2  ;;  %v218_v3 = vpop.f32.mrb[12].mxu0 }
 0x136   :  { %v219_v4 = vadd.f32 %v218_v3, %v654_v23  ;;  %v220_v5 = vpop.f32.mrb[13].mxu0 }
 0x137   :  { %v221_v6 = vadd.f32 %v220_v5, %v656_v24 }
 0x138   :  { %352 = vst [vmem:[#allocation7 + $0x90] sm:$0xff] %v219_v4 }
 0x139   :  { %353 = vst [vmem:[#allocation7 + $0x98] sm:$0xff] %v221_v6  ;;  %v224_v7 = vpop.f32.mrb[14].mxu0 }
 0x13a   :  { %v225_v8 = vadd.f32 %v224_v7, %v654_v23  ;;  %v226_v9 = vpop.f32.mrb[15].mxu0 }
 0x13b   :  { %v227_v10 = vadd.f32 %v226_v9, %v656_v24 }
 0x13c   :  { %355 = vst [vmem:[#allocation7 + $0xa8] sm:$0xff] %v225_v8 }
 0x13d   :  { %356 = vst [vmem:[#allocation7 + $0xb0] sm:$0xff] %v227_v10 }
 0x13e   :  { %571 = shalt.err (!%p568_p6)
}
 0x13f   :  { %s572_s17 = scalar_lea.hbm %s692_s3, 3072 }
 0x140   :  { %p573_p7 = scmp.ne.s32.totalorder %s692_s3, %s572_s17  ;;  %p576_p8 = scmp.lt.u32.totalorder %s572_s17, %s692_s3 }
 0x142   :  { %p578_p9 = pnand %p576_p8, %p573_p7 }
 0x144   :  { %581 = shalt.err (!%p578_p9)
}
 0x145   :  { %369 = dma.vmem_to_hbm [thread:$0]  %s364_s13, 3072, %s692_s3, [#allocation4], %s592_s0, %s592_s0, %s593_s9  }
 0x146   :  { %586 = dma.done.wait [#allocation4], 3072  }
 0x147   :  { %587 = vsyncadd [#allocation4], 4294964224 }
 0x148   :  { %373 = vsyncpa [#allocation3], 1 }
 0x149   :  { %374 = vsyncpa [#allocation6], 1 }
 0x14a   :  { %375 = vsyncpa [#allocation4], 1 }

</bundles_post_ra>
